<compile_context>
chip_gen: v6e
topology: v6e:2x2x1
jax: 0.10.0
libtpu: 0.0.40
codegen_flags: <defaults>
</compile_context>

<pallas_src>
import functools
import math

import jax
import jax.numpy as jnp
import numpy as np
from jax.experimental import pallas as pl
from jax.experimental.pallas import tpu as pltpu


def _topk_pool_kernel(x_ref, o_ref, *, k, n, max_aligned, sorted_order, rotate_only):
    x = x_ref[...].astype(jnp.float32)                        # (n, bc)
    bc = x.shape[1]
    row_iota = jax.lax.broadcasted_iota(jnp.int32, (n, bc), 0)

    if max_aligned:
        col_max = jnp.max(x, axis=0, keepdims=True)           # (1, bc)
        is_max = x == col_max
        # first-occurrence argmax per column
        max_idx = jnp.min(jnp.where(is_max, row_iota, n), axis=0, keepdims=True)
        d = row_iota - max_idx                                # range (-n, n)
        pos = d + jnp.where(d < 0, n, 0)                      # (row - argmax) mod n, no remainder
    else:
        pos = row_iota

    if rotate_only:
        # k == n with 'max-aligned': pure per-column rotation.  pos is a
        # permutation of [0, n) in every column, so a masked cross-sublane sum
        # extracts each rotated row exactly — no top-k selection loop needed.
        out_iota = jax.lax.broadcasted_iota(jnp.int32, (n, bc), 0)
        out = jnp.zeros((n, bc), jnp.float32)
        for j in range(n):
            row_j = jnp.sum(jnp.where(pos == j, x, 0.0), axis=0, keepdims=True)
            out = out + jnp.where(out_iota == j, row_j, 0.0)
        o_ref[...] = out.astype(o_ref.dtype)
        return

    neg_inf = jnp.float32(-jnp.inf)
    sel_vals = []   # (1, bc) selected values, descending
    sel_pos = []    # (1, bc) their (rotated) positions
    if max_aligned:
        # Fused round 0: after rotation the maximum sits at position 0, so the
        # first selection is (col_max, 0) with no extra cross-sublane reductions.
        sel_vals.append(col_max)
        sel_pos.append(jnp.zeros_like(max_idx))
        cur = jnp.where(pos == 0, neg_inf, x)
        rounds = k - 1
    else:
        cur = x
        rounds = k
    for _ in range(rounds):
        rmax = jnp.max(cur, axis=0, keepdims=True)
        cand = cur == rmax
        psel = jnp.min(jnp.where(cand, pos, n), axis=0, keepdims=True)
        sel_vals.append(rmax)
        sel_pos.append(psel)
        cur = jnp.where(pos == psel, neg_inf, cur)            # mask out the picked sublane

    out_iota = jax.lax.broadcasted_iota(jnp.int32, (k, bc), 0)
    out = jnp.zeros((k, bc), jnp.float32)
    if sorted_order:
        # torch.topk default: sorted descending by value
        for t in range(k):
            out = out + jnp.where(out_iota == t, sel_vals[t], 0.0)
    else:
        # order of appearance (in the rotated row for 'max-aligned'):
        # rank each selection by its position, scatter via one-hot masks
        for t in range(k):
            rank_t = jnp.zeros_like(sel_pos[t])
            for u in range(k):
                rank_t = rank_t + (sel_pos[u] < sel_pos[t]).astype(jnp.int32)
            out = out + jnp.where(out_iota == rank_t, sel_vals[t], 0.0)
    o_ref[...] = out.astype(o_ref.dtype)


def topk_pool(x, k, dim=-1, order="max-aligned"):
    """Pallas implementation of TopKPool.forward."""
    max_aligned = order == "max-aligned"
    sorted_order = order == "sorted"

    x_m = jnp.moveaxis(x, dim, -1)
    lead = x_m.shape[:-1]
    n = x_m.shape[-1]
    r = math.prod(lead)

    if k == n and not max_aligned:
        # Module early-returns the tensor unchanged when k == n (no rotation).
        return x
    rotate_only = (k == n) and max_aligned

    # Rows on lanes, pooled dim on sublanes.
    x2 = x_m.reshape(r, n).T                                   # (n, r)

    # Lane-dense column tiles: multiple of 128, 128..1024 wide, and (when the
    # problem is big enough) >=2 grid steps so both v7x TensorCores get fed.
    r128 = pl.cdiv(r, 128) * 128
    bc = max(128, min(1024, (r128 // 2 // 128) * 128))
    r_pad = pl.cdiv(r, bc) * bc
    if r_pad != r:
        x2 = jnp.pad(x2, ((0, 0), (0, r_pad - r)))             # padded cols are independent; sliced off below
    grid = (r_pad // bc,)

    kernel = functools.partial(
        _topk_pool_kernel, k=k, n=n, max_aligned=max_aligned,
        sorted_order=sorted_order, rotate_only=rotate_only)
    out2 = pl.pallas_call(
        kernel,
        out_shape=jax.ShapeDtypeStruct((k, r_pad), x.dtype),
        grid_spec=pltpu.PrefetchScalarGridSpec(
            num_scalar_prefetch=0,
            grid=grid,
            in_specs=[pl.BlockSpec((n, bc), lambda i: (0, i))],
            out_specs=pl.BlockSpec((k, bc), lambda i: (0, i)),
        ),
        compiler_params=pltpu.CompilerParams(dimension_semantics=("parallel",)),
    )(x2)

    out = out2[:, :r].T.reshape(*lead, k)
    return jnp.moveaxis(out, -1, dim)


def _reference_topk_pool(x, k, order="max-aligned"):
    """Pure-JAX mirror of the PyTorch module (dim=-1)."""
    max_aligned = order == "max-aligned"
    sorted_ = order == "sorted"
    n = x.shape[-1]
    if max_aligned:
        idx = jnp.argmax(x, axis=-1)[..., None]
        gidx = (jnp.arange(n) + idx) % n
        x = jnp.take_along_axis(x, gidx, axis=-1)
    if k == n:
        return x
    vals, i = jax.lax.top_k(x, k)
    if not sorted_:
        i = jnp.sort(i, axis=-1)
        vals = jnp.take_along_axis(x, i, axis=-1)
    return vals


if __name__ == "__main__":
    key = jax.random.PRNGKey(0)
    x = jax.random.normal(key, (2, 4, 16, 16), dtype=jnp.float32)   # NCHW-style input
    k = 5

    # primary path: max-aligned top-k
    out = topk_pool(x, k, dim=-1, order="max-aligned")
    out = jax.block_until_ready(out)
    assert out.shape == (2, 4, 16, k), out.shape
    np.testing.assert_allclose(
        np.asarray(out),
        np.asarray(_reference_topk_pool(x, k, order="max-aligned")),
        rtol=1e-6, atol=1e-6)

    # other orders
    for order in ("sorted", "unsorted"):
        o = jax.block_until_ready(topk_pool(x, k, dim=-1, order=order))
        np.testing.assert_allclose(
            np.asarray(o), np.asarray(_reference_topk_pool(x, k, order=order)),
            rtol=1e-6, atol=1e-6)

    # tie-breaking with duplicated maxima (first-occurrence behaviour)
    x_dup = jnp.where(x > 0.5, jnp.float32(2.0), x)
    for order in ("max-aligned", "sorted", "unsorted"):
        o = jax.block_until_ready(topk_pool(x_dup, k, dim=-1, order=order))
        np.testing.assert_allclose(
            np.asarray(o), np.asarray(_reference_topk_pool(x_dup, k, order=order)),
            rtol=1e-6, atol=1e-6)

    # k == n: pure rotation path ('max-aligned') and pass-through otherwise
    o_rot = jax.block_until_ready(topk_pool(x, 16, dim=-1, order="max-aligned"))
    np.testing.assert_allclose(
        np.asarray(o_rot),
        np.asarray(_reference_topk_pool(x, 16, order="max-aligned")),
        rtol=1e-6, atol=1e-6)
    o_id = jax.block_until_ready(topk_pool(x, 16, dim=-1, order="unsorted"))
    np.testing.assert_allclose(np.asarray(o_id), np.asarray(x), rtol=0, atol=0)

    print("KERNEL_OK")
</pallas_src>

<mosaic_0001>
module attributes {stable_mosaic.version = 11 : i64} {
  func.func @_topk_pool_kernel(%arg0: i32, %arg1: memref<16x128xf32, #tpu.memory_space<vmem>>, %arg2: memref<5x128xf32, #tpu.memory_space<vmem>>) attributes {dimension_semantics = [#tpu.dimension_semantics<parallel>], iteration_bounds = array<i64: 1>, scalar_prefetch = 0 : i64, scratch_operands = 0 : i64, tpu.core_type = #tpu.core_type<tc>, window_params = [{transform_indices = @transform_0, window_bounds = array<i64: 16, 128>}, {transform_indices = @transform_1, window_bounds = array<i64: 5, 128>}]} {
    %c0 = arith.constant 0 : index
    %c0_0 = arith.constant 0 : index
    %0 = vector.load %arg1[%c0, %c0_0] : memref<16x128xf32, #tpu.memory_space<vmem>>, vector<16x128xf32>
    %1 = tpu.iota {dimensions = array<i32: 0>} : vector<16x128xi32>
    %cst = arith.constant dense<0xFF800000> : vector<128xf32>
    %2 = vector.multi_reduction <maximumf>, %0, %cst [0] : vector<16x128xf32> to vector<128xf32>
    %3 = vector.shape_cast %2 : vector<128xf32> to vector<1x128xf32>
    %4 = vector.broadcast %3 : vector<1x128xf32> to vector<16x128xf32>
    %5 = arith.cmpf oeq, %0, %4 : vector<16x128xf32>
    %c16_i32 = arith.constant 16 : i32
    %6 = vector.broadcast %c16_i32 : i32 to vector<16x128xi32>
    %7 = arith.select %5, %1, %6 : vector<16x128xi1>, vector<16x128xi32>
    %cst_1 = arith.constant dense<2147483647> : vector<128xi32>
    %8 = vector.multi_reduction <minsi>, %7, %cst_1 [0] : vector<16x128xi32> to vector<128xi32>
    %9 = vector.shape_cast %8 : vector<128xi32> to vector<1x128xi32>
    %10 = vector.broadcast %9 : vector<1x128xi32> to vector<16x128xi32>
    %11 = arith.subi %1, %10 : vector<16x128xi32>
    %c0_i32 = arith.constant 0 : i32
    %12 = vector.broadcast %c0_i32 : i32 to vector<16x128xi32>
    %13 = arith.cmpi slt, %11, %12 : vector<16x128xi32>
    %c16_i32_2 = arith.constant 16 : i32
    %c0_i32_3 = arith.constant 0 : i32
    %14 = vector.broadcast %c16_i32_2 : i32 to vector<16x128xi32>
    %15 = vector.broadcast %c0_i32_3 : i32 to vector<16x128xi32>
    %16 = arith.select %13, %14, %15 : vector<16x128xi1>, vector<16x128xi32>
    %17 = arith.addi %11, %16 : vector<16x128xi32>
    %c0_i32_4 = arith.constant 0 : i32
    %18 = vector.broadcast %c0_i32_4 : i32 to vector<1x128xi32>
    %c0_i32_5 = arith.constant 0 : i32
    %19 = vector.broadcast %c0_i32_5 : i32 to vector<16x128xi32>
    %20 = arith.cmpi eq, %17, %19 : vector<16x128xi32>
    %cst_6 = arith.constant 0xFF800000 : f32
    %21 = vector.broadcast %cst_6 : f32 to vector<16x128xf32>
    %22 = arith.select %20, %21, %0 : vector<16x128xi1>, vector<16x128xf32>
    %cst_7 = arith.constant dense<0xFF800000> : vector<128xf32>
    %23 = vector.multi_reduction <maximumf>, %22, %cst_7 [0] : vector<16x128xf32> to vector<128xf32>
    %24 = vector.shape_cast %23 : vector<128xf32> to vector<1x128xf32>
    %25 = vector.broadcast %24 : vector<1x128xf32> to vector<16x128xf32>
    %26 = arith.cmpf oeq, %22, %25 : vector<16x128xf32>
    %c16_i32_8 = arith.constant 16 : i32
    %27 = vector.broadcast %c16_i32_8 : i32 to vector<16x128xi32>
    %28 = arith.select %26, %17, %27 : vector<16x128xi1>, vector<16x128xi32>
    %cst_9 = arith.constant dense<2147483647> : vector<128xi32>
    %29 = vector.multi_reduction <minsi>, %28, %cst_9 [0] : vector<16x128xi32> to vector<128xi32>
    %30 = vector.shape_cast %29 : vector<128xi32> to vector<1x128xi32>
    %31 = vector.broadcast %30 : vector<1x128xi32> to vector<16x128xi32>
    %32 = arith.cmpi eq, %17, %31 : vector<16x128xi32>
    %cst_10 = arith.constant 0xFF800000 : f32
    %33 = vector.broadcast %cst_10 : f32 to vector<16x128xf32>
    %34 = arith.select %32, %33, %22 : vector<16x128xi1>, vector<16x128xf32>
    %cst_11 = arith.constant dense<0xFF800000> : vector<128xf32>
    %35 = vector.multi_reduction <maximumf>, %34, %cst_11 [0] : vector<16x128xf32> to vector<128xf32>
    %36 = vector.shape_cast %35 : vector<128xf32> to vector<1x128xf32>
    %37 = vector.broadcast %36 : vector<1x128xf32> to vector<16x128xf32>
    %38 = arith.cmpf oeq, %34, %37 : vector<16x128xf32>
    %c16_i32_12 = arith.constant 16 : i32
    %39 = vector.broadcast %c16_i32_12 : i32 to vector<16x128xi32>
    %40 = arith.select %38, %17, %39 : vector<16x128xi1>, vector<16x128xi32>
    %cst_13 = arith.constant dense<2147483647> : vector<128xi32>
    %41 = vector.multi_reduction <minsi>, %40, %cst_13 [0] : vector<16x128xi32> to vector<128xi32>
    %42 = vector.shape_cast %41 : vector<128xi32> to vector<1x128xi32>
    %43 = vector.broadcast %42 : vector<1x128xi32> to vector<16x128xi32>
    %44 = arith.cmpi eq, %17, %43 : vector<16x128xi32>
    %cst_14 = arith.constant 0xFF800000 : f32
    %45 = vector.broadcast %cst_14 : f32 to vector<16x128xf32>
    %46 = arith.select %44, %45, %34 : vector<16x128xi1>, vector<16x128xf32>
    %cst_15 = arith.constant dense<0xFF800000> : vector<128xf32>
    %47 = vector.multi_reduction <maximumf>, %46, %cst_15 [0] : vector<16x128xf32> to vector<128xf32>
    %48 = vector.shape_cast %47 : vector<128xf32> to vector<1x128xf32>
    %49 = vector.broadcast %48 : vector<1x128xf32> to vector<16x128xf32>
    %50 = arith.cmpf oeq, %46, %49 : vector<16x128xf32>
    %c16_i32_16 = arith.constant 16 : i32
    %51 = vector.broadcast %c16_i32_16 : i32 to vector<16x128xi32>
    %52 = arith.select %50, %17, %51 : vector<16x128xi1>, vector<16x128xi32>
    %cst_17 = arith.constant dense<2147483647> : vector<128xi32>
    %53 = vector.multi_reduction <minsi>, %52, %cst_17 [0] : vector<16x128xi32> to vector<128xi32>
    %54 = vector.shape_cast %53 : vector<128xi32> to vector<1x128xi32>
    %55 = vector.broadcast %54 : vector<1x128xi32> to vector<16x128xi32>
    %56 = arith.cmpi eq, %17, %55 : vector<16x128xi32>
    %cst_18 = arith.constant 0xFF800000 : f32
    %57 = vector.broadcast %cst_18 : f32 to vector<16x128xf32>
    %58 = arith.select %56, %57, %46 : vector<16x128xi1>, vector<16x128xf32>
    %cst_19 = arith.constant dense<0xFF800000> : vector<128xf32>
    %59 = vector.multi_reduction <maximumf>, %58, %cst_19 [0] : vector<16x128xf32> to vector<128xf32>
    %60 = vector.shape_cast %59 : vector<128xf32> to vector<1x128xf32>
    %61 = vector.broadcast %60 : vector<1x128xf32> to vector<16x128xf32>
    %62 = arith.cmpf oeq, %58, %61 : vector<16x128xf32>
    %c16_i32_20 = arith.constant 16 : i32
    %63 = vector.broadcast %c16_i32_20 : i32 to vector<16x128xi32>
    %64 = arith.select %62, %17, %63 : vector<16x128xi1>, vector<16x128xi32>
    %cst_21 = arith.constant dense<2147483647> : vector<128xi32>
    %65 = vector.multi_reduction <minsi>, %64, %cst_21 [0] : vector<16x128xi32> to vector<128xi32>
    %66 = vector.shape_cast %65 : vector<128xi32> to vector<1x128xi32>
    %67 = tpu.iota {dimensions = array<i32: 0>} : vector<5x128xi32>
    %cst_22 = arith.constant 0.000000e+00 : f32
    %68 = vector.broadcast %cst_22 : f32 to vector<5x128xf32>
    %c0_i32_23 = arith.constant 0 : i32
    %69 = vector.broadcast %c0_i32_23 : i32 to vector<1x128xi32>
    %70 = arith.cmpi slt, %18, %18 : vector<1x128xi32>
    %71 = arith.extui %70 : vector<1x128xi1> to vector<1x128xi32>
    %72 = arith.addi %69, %71 : vector<1x128xi32>
    %73 = arith.cmpi slt, %30, %18 : vector<1x128xi32>
    %74 = arith.extui %73 : vector<1x128xi1> to vector<1x128xi32>
    %75 = arith.addi %72, %74 : vector<1x128xi32>
    %76 = arith.cmpi slt, %42, %18 : vector<1x128xi32>
    %77 = arith.extui %76 : vector<1x128xi1> to vector<1x128xi32>
    %78 = arith.addi %75, %77 : vector<1x128xi32>
    %79 = arith.cmpi slt, %54, %18 : vector<1x128xi32>
    %80 = arith.extui %79 : vector<1x128xi1> to vector<1x128xi32>
    %81 = arith.addi %78, %80 : vector<1x128xi32>
    %82 = arith.cmpi slt, %66, %18 : vector<1x128xi32>
    %83 = arith.extui %82 : vector<1x128xi1> to vector<1x128xi32>
    %84 = arith.addi %81, %83 : vector<1x128xi32>
    %85 = vector.broadcast %84 : vector<1x128xi32> to vector<5x128xi32>
    %86 = arith.cmpi eq, %67, %85 : vector<5x128xi32>
    %cst_24 = arith.constant 0.000000e+00 : f32
    %87 = vector.shape_cast %3 : vector<1x128xf32> to vector<1x128xf32>
    %88 = vector.broadcast %87 : vector<1x128xf32> to vector<5x128xf32>
    %89 = vector.broadcast %cst_24 : f32 to vector<5x128xf32>
    %90 = arith.select %86, %88, %89 : vector<5x128xi1>, vector<5x128xf32>
    %91 = arith.addf %68, %90 : vector<5x128xf32>
    %c0_i32_25 = arith.constant 0 : i32
    %92 = vector.broadcast %c0_i32_25 : i32 to vector<1x128xi32>
    %93 = arith.cmpi slt, %18, %30 : vector<1x128xi32>
    %94 = arith.extui %93 : vector<1x128xi1> to vector<1x128xi32>
    %95 = arith.addi %92, %94 : vector<1x128xi32>
    %96 = arith.cmpi slt, %30, %30 : vector<1x128xi32>
    %97 = arith.extui %96 : vector<1x128xi1> to vector<1x128xi32>
    %98 = arith.addi %95, %97 : vector<1x128xi32>
    %99 = arith.cmpi slt, %42, %30 : vector<1x128xi32>
    %100 = arith.extui %99 : vector<1x128xi1> to vector<1x128xi32>
    %101 = arith.addi %98, %100 : vector<1x128xi32>
    %102 = arith.cmpi slt, %54, %30 : vector<1x128xi32>
    %103 = arith.extui %102 : vector<1x128xi1> to vector<1x128xi32>
    %104 = arith.addi %101, %103 : vector<1x128xi32>
    %105 = arith.cmpi slt, %66, %30 : vector<1x128xi32>
    %106 = arith.extui %105 : vector<1x128xi1> to vector<1x128xi32>
    %107 = arith.addi %104, %106 : vector<1x128xi32>
    %108 = vector.broadcast %107 : vector<1x128xi32> to vector<5x128xi32>
    %109 = arith.cmpi eq, %67, %108 : vector<5x128xi32>
    %cst_26 = arith.constant 0.000000e+00 : f32
    %110 = vector.shape_cast %24 : vector<1x128xf32> to vector<1x128xf32>
    %111 = vector.broadcast %110 : vector<1x128xf32> to vector<5x128xf32>
    %112 = vector.broadcast %cst_26 : f32 to vector<5x128xf32>
    %113 = arith.select %109, %111, %112 : vector<5x128xi1>, vector<5x128xf32>
    %114 = arith.addf %91, %113 : vector<5x128xf32>
    %c0_i32_27 = arith.constant 0 : i32
    %115 = vector.broadcast %c0_i32_27 : i32 to vector<1x128xi32>
    %116 = arith.cmpi slt, %18, %42 : vector<1x128xi32>
    %117 = arith.extui %116 : vector<1x128xi1> to vector<1x128xi32>
    %118 = arith.addi %115, %117 : vector<1x128xi32>
    %119 = arith.cmpi slt, %30, %42 : vector<1x128xi32>
    %120 = arith.extui %119 : vector<1x128xi1> to vector<1x128xi32>
    %121 = arith.addi %118, %120 : vector<1x128xi32>
    %122 = arith.cmpi slt, %42, %42 : vector<1x128xi32>
    %123 = arith.extui %122 : vector<1x128xi1> to vector<1x128xi32>
    %124 = arith.addi %121, %123 : vector<1x128xi32>
    %125 = arith.cmpi slt, %54, %42 : vector<1x128xi32>
    %126 = arith.extui %125 : vector<1x128xi1> to vector<1x128xi32>
    %127 = arith.addi %124, %126 : vector<1x128xi32>
    %128 = arith.cmpi slt, %66, %42 : vector<1x128xi32>
    %129 = arith.extui %128 : vector<1x128xi1> to vector<1x128xi32>
    %130 = arith.addi %127, %129 : vector<1x128xi32>
    %131 = vector.broadcast %130 : vector<1x128xi32> to vector<5x128xi32>
    %132 = arith.cmpi eq, %67, %131 : vector<5x128xi32>
    %cst_28 = arith.constant 0.000000e+00 : f32
    %133 = vector.shape_cast %36 : vector<1x128xf32> to vector<1x128xf32>
    %134 = vector.broadcast %133 : vector<1x128xf32> to vector<5x128xf32>
    %135 = vector.broadcast %cst_28 : f32 to vector<5x128xf32>
    %136 = arith.select %132, %134, %135 : vector<5x128xi1>, vector<5x128xf32>
    %137 = arith.addf %114, %136 : vector<5x128xf32>
    %c0_i32_29 = arith.constant 0 : i32
    %138 = vector.broadcast %c0_i32_29 : i32 to vector<1x128xi32>
    %139 = arith.cmpi slt, %18, %54 : vector<1x128xi32>
    %140 = arith.extui %139 : vector<1x128xi1> to vector<1x128xi32>
    %141 = arith.addi %138, %140 : vector<1x128xi32>
    %142 = arith.cmpi slt, %30, %54 : vector<1x128xi32>
    %143 = arith.extui %142 : vector<1x128xi1> to vector<1x128xi32>
    %144 = arith.addi %141, %143 : vector<1x128xi32>
    %145 = arith.cmpi slt, %42, %54 : vector<1x128xi32>
    %146 = arith.extui %145 : vector<1x128xi1> to vector<1x128xi32>
    %147 = arith.addi %144, %146 : vector<1x128xi32>
    %148 = arith.cmpi slt, %54, %54 : vector<1x128xi32>
    %149 = arith.extui %148 : vector<1x128xi1> to vector<1x128xi32>
    %150 = arith.addi %147, %149 : vector<1x128xi32>
    %151 = arith.cmpi slt, %66, %54 : vector<1x128xi32>
    %152 = arith.extui %151 : vector<1x128xi1> to vector<1x128xi32>
    %153 = arith.addi %150, %152 : vector<1x128xi32>
    %154 = vector.broadcast %153 : vector<1x128xi32> to vector<5x128xi32>
    %155 = arith.cmpi eq, %67, %154 : vector<5x128xi32>
    %cst_30 = arith.constant 0.000000e+00 : f32
    %156 = vector.shape_cast %48 : vector<1x128xf32> to vector<1x128xf32>
    %157 = vector.broadcast %156 : vector<1x128xf32> to vector<5x128xf32>
    %158 = vector.broadcast %cst_30 : f32 to vector<5x128xf32>
    %159 = arith.select %155, %157, %158 : vector<5x128xi1>, vector<5x128xf32>
    %160 = arith.addf %137, %159 : vector<5x128xf32>
    %c0_i32_31 = arith.constant 0 : i32
    %161 = vector.broadcast %c0_i32_31 : i32 to vector<1x128xi32>
    %162 = arith.cmpi slt, %18, %66 : vector<1x128xi32>
    %163 = arith.extui %162 : vector<1x128xi1> to vector<1x128xi32>
    %164 = arith.addi %161, %163 : vector<1x128xi32>
    %165 = arith.cmpi slt, %30, %66 : vector<1x128xi32>
    %166 = arith.extui %165 : vector<1x128xi1> to vector<1x128xi32>
    %167 = arith.addi %164, %166 : vector<1x128xi32>
    %168 = arith.cmpi slt, %42, %66 : vector<1x128xi32>
    %169 = arith.extui %168 : vector<1x128xi1> to vector<1x128xi32>
    %170 = arith.addi %167, %169 : vector<1x128xi32>
    %171 = arith.cmpi slt, %54, %66 : vector<1x128xi32>
    %172 = arith.extui %171 : vector<1x128xi1> to vector<1x128xi32>
    %173 = arith.addi %170, %172 : vector<1x128xi32>
    %174 = arith.cmpi slt, %66, %66 : vector<1x128xi32>
    %175 = arith.extui %174 : vector<1x128xi1> to vector<1x128xi32>
    %176 = arith.addi %173, %175 : vector<1x128xi32>
    %177 = vector.broadcast %176 : vector<1x128xi32> to vector<5x128xi32>
    %178 = arith.cmpi eq, %67, %177 : vector<5x128xi32>
    %cst_32 = arith.constant 0.000000e+00 : f32
    %179 = vector.shape_cast %60 : vector<1x128xf32> to vector<1x128xf32>
    %180 = vector.broadcast %179 : vector<1x128xf32> to vector<5x128xf32>
    %181 = vector.broadcast %cst_32 : f32 to vector<5x128xf32>
    %182 = arith.select %178, %180, %181 : vector<5x128xi1>, vector<5x128xf32>
    %183 = arith.addf %160, %182 : vector<5x128xf32>
    %c0_33 = arith.constant 0 : index
    %c0_34 = arith.constant 0 : index
    %184 = vector.load %arg2[%c0_33, %c0_34] : memref<5x128xf32, #tpu.memory_space<vmem>>, vector<5x128xf32>
    tpu.vector_store %arg2[%c0_33, %c0_34], %183 {strides = array<i32>} : memref<5x128xf32, #tpu.memory_space<vmem>>, vector<5x128xf32>,
    return
  }
  func.func @transform_0(%arg0: i32) -> (i32, i32) {
    %c0_i32 = arith.constant 0 : i32
    %c0_i32_0 = arith.constant 0 : i32
    return %c0_i32, %arg0 : i32, i32
  }
  func.func @transform_1(%arg0: i32) -> (i32, i32) {
    %c0_i32 = arith.constant 0 : i32
    %c0_i32_0 = arith.constant 0 : i32
    return %c0_i32, %arg0 : i32, i32
  }
}

</mosaic_0001>

<bundles_post_ra>
// kernel: tpu_custom_call.1
= control target key start
LH: loop header
LB: loop body
LE: loop exit
PB: predicated region body
PF: predicated region fallthrough
CT: control target
= control target key end

     0   :  { %6 = vsyncpa [#allocation3], 0  ;;  %s431_s0 = inlined_call_operand.hbm [shape: f32[16,128], index: 0, kind: input, shape index: {}]   ;;  %s432_s1 = inlined_call_operand.hbm [shape: f32[5,128], index: 1, kind: output, shape index: {}]  }
   0x1   :  { %7 = vsyncpa [#allocation4], 0  ;;  %s297_s6 = smov [#allocation2]  }
   0x2   :  { %s13_s7 = sshll.u32 %s297_s6, 4  ;;  %s14_s7 = int_to_ptr.vmem [resolvable:$true] %s13_s7 }
   0x3   :  { %s261_s8 = scalar_lea.vmem %s14_s7, 256  ;;  %p266_p1 = scmp.lt.s32.totalorder %s14_s7, %s14_s7 }
   0x4   :  { %p262_p0 = scmp.ne.s32.totalorder %s14_s7, %s261_s8  ;;  %p267_p2 = scmp.lt.s32.totalorder %s261_s8, %s261_s8 }
   0x6   :  { %p268_p3 = por %p267_p2, %p266_p1 }
   0x8   :  { %p269_p4 = pnand %p268_p3, %p262_p0 }
   0xa   :  { %272 = shalt.err (!%p269_p4)
}
   0xb   :  { %s298_s9 = smov 128   ;;  %s299_s10 = smov 8  }
   0xc   :  { %19 = dma.hbm_to_vmem [thread:$0]  %s431_s0, 256, %s14_s7, [#allocation3], %s298_s9, %s298_s9, %s299_s10  }
   0xd   :  { %293 = dma.done.wait [#allocation3], 256  }
   0xe   :  { %294 = vsyncadd [#allocation3], 4294967040  ;;  %v23_v0 = vld [vmem:[#allocation2] sm:$0xff]  ;;  %v24_v1 = vld [vmem:[#allocation2 + $0x8] sm:$0xff]  ;;  %v25_v4 = vlaneseq  ;;  %v300_v23 = vmov 0   ;;  %s301_s0 = smov [#allocation5]  }
   0xf   :  { %v28_v2 = vmax.f32 %v23_v0, %v24_v1  ;;  %s239_s13 = sshll.u32 %s301_s0, 4  ;;  %s240_s13 = int_to_ptr.vmem [resolvable:$true] %s239_s13 }
  0x10   :  { %v315_v7 = vshrl.u32 %v25_v4, 7  ;;  %s273_s14 = scalar_lea.vmem %s240_s13, 128  ;;  %p278_p6 = scmp.lt.s32.totalorder %s240_s13, %s240_s13 }
  0x11   :  { %v29_v3 = vrot.slane %v28_v2, 4  ;;  %p274_p5 = scmp.ne.s32.totalorder %s240_s13, %s273_s14  ;;  %p279_p7 = scmp.lt.s32.totalorder %s273_s14, %s273_s14 }
  0x12   :  { %v27_v10 = vadd.s32 8, %v315_v7 }
  0x13   :  { %v30_v5 = vmax.f32 %v28_v2, %v29_v3  ;;  %p280_p8 = por %p279_p7, %p278_p6 }
  0x15   :  { %v31_v6 = vrot.slane %v30_v5, 2  ;;  %p281_p9 = pnand %p280_p8, %p274_p5 }
  0x17   :  { %v32_v8 = vmax.f32 %v30_v5, %v31_v6 }
  0x19   :  { %v33_v9 = vrot.slane %v32_v8, 1 }
  0x1b   :  { %v318_v11 = vmax.f32 %v32_v8, %v33_v9 }
  0x1d   :  { %vm35_vm0 = vcmp.eq.f32.partialorder %v23_v0, %v318_v11  ;;  %vm36_vm1 = vcmp.eq.f32.partialorder %v24_v1, %v318_v11 }
  0x1e   :  { %v37_v12 = vsel %vm35_vm0, %v315_v7, 16  ;;  %v38_v13 = vsel %vm36_vm1, %v27_v10, 16 }
  0x1f   :  { %vm39_vm2 = vcmp.lt.s32.totalorder %v37_v12, %v38_v13 }
  0x20   :  { %v40_v14 = vsel %vm39_vm2, %v37_v12, %v38_v13 }
  0x21   :  { %v41_v15 = vrot.slane %v40_v14, 4 }
  0x23   :  { %vm42_vm3 = vcmp.lt.s32.totalorder %v40_v14, %v41_v15 }
  0x24   :  { %v43_v16 = vsel %vm42_vm3, %v40_v14, %v41_v15 }
  0x25   :  { %v44_v17 = vrot.slane %v43_v16, 2 }
  0x27   :  { %vm45_vm4 = vcmp.lt.s32.totalorder %v43_v16, %v44_v17 }
  0x28   :  { %v46_v18 = vsel %vm45_vm4, %v43_v16, %v44_v17 }
  0x29   :  { %v47_v19 = vrot.slane %v46_v18, 1 }
  0x2b   :  { %vm48_vm5 = vcmp.lt.s32.totalorder %v46_v18, %v47_v19 }
  0x2c   :  { %v49_v20 = vsel %vm48_vm5, %v46_v18, %v47_v19 }
  0x2d   :  { %v50_v21 = vsub.s32 %v315_v7, %v49_v20  ;;  %v51_v22 = vsub.s32 %v27_v10, %v49_v20 }
  0x2f   :  { %vm52_vm6 = vcmp.lt.s32.totalorder %v50_v21, 0  ;;  %vm53_vm7 = vcmp.lt.s32.totalorder %v51_v22, 0 }
  0x30   :  { %v54_v24 = vsel %vm52_vm6, 16, %v300_v23  ;;  %v55_v25 = vsel %vm53_vm7, 16, %v300_v23 }
  0x31   :  { %v326_v26 = vadd.s32 %v54_v24, %v50_v21  ;;  %v328_v27 = vadd.s32 %v55_v25, %v51_v22 }
  0x33   :  { %vm58_vm8 = vcmp.eq.s32.totalorder %v326_v26, 0  ;;  %vm59_vm9 = vcmp.eq.s32.totalorder %v328_v27, 0 }
  0x34   :  { %v60_v28 = vsel %vm58_vm8, -inf, %v23_v0  ;;  %v61_v29 = vsel %vm59_vm9, -inf, %v24_v1 }
  0x35   :  { %v62_v30 = vmax.f32 %v60_v28, %v61_v29 }
  0x37   :  { %v63_v31 = vrot.slane %v62_v30, 4 }
  0x39   :  { %v64_v32 = vmax.f32 %v62_v30, %v63_v31 }
  0x3b   :  { %v65_v33 = vrot.slane %v64_v32, 2 }
  0x3d   :  { %v66_v34 = vmax.f32 %v64_v32, %v65_v33 }
  0x3f   :  { %v67_v35 = vrot.slane %v66_v34, 1 }
  0x41   :  { %v332_v36 = vmax.f32 %v66_v34, %v67_v35 }
  0x43   :  { %vm69_vm10 = vcmp.eq.f32.partialorder %v60_v28, %v332_v36  ;;  %vm70_vm11 = vcmp.eq.f32.partialorder %v61_v29, %v332_v36 }
  0x44   :  { %v71_v37 = vsel %vm69_vm10, %v326_v26, 16  ;;  %v72_v38 = vsel %vm70_vm11, %v328_v27, 16 }
  0x45   :  { %vm73_vm12 = vcmp.lt.s32.totalorder %v71_v37, %v72_v38 }
  0x46   :  { %v74_v39 = vsel %vm73_vm12, %v71_v37, %v72_v38 }
  0x47   :  { %v75_v40 = vrot.slane %v74_v39, 4 }
  0x49   :  { %vm76_vm13 = vcmp.lt.s32.totalorder %v74_v39, %v75_v40 }
  0x4a   :  { %v77_v41 = vsel %vm76_vm13, %v74_v39, %v75_v40 }
  0x4b   :  { %v78_v42 = vrot.slane %v77_v41, 2 }
  0x4d   :  { %vm79_vm14 = vcmp.lt.s32.totalorder %v77_v41, %v78_v42 }
  0x4e   :  { %v80_v43 = vsel %vm79_vm14, %v77_v41, %v78_v42 }
  0x4f   :  { %v81_v44 = vrot.slane %v80_v43, 1 }
  0x51   :  { %vm82_vm15 = vcmp.lt.s32.totalorder %v80_v43, %v81_v44 }
  0x52   :  { %v338_v45 = vsel %vm82_vm15, %v80_v43, %v81_v44 }
  0x53   :  { %vm84_vm0 = vcmp.eq.s32.totalorder %v326_v26, %v338_v45  ;;  %vm85_vm1 = vcmp.eq.s32.totalorder %v328_v27, %v338_v45 }
  0x54   :  { %v86_v46 = vsel %vm84_vm0, -inf, %v60_v28  ;;  %v87_v47 = vsel %vm85_vm1, -inf, %v61_v29 }
  0x55   :  { %v88_v48 = vmax.f32 %v86_v46, %v87_v47 }
  0x57   :  { %v89_v49 = vrot.slane %v88_v48, 4 }
  0x59   :  { %v90_v50 = vmax.f32 %v88_v48, %v89_v49 }
  0x5b   :  { %v91_v51 = vrot.slane %v90_v50, 2 }
  0x5d   :  { %v92_v52 = vmax.f32 %v90_v50, %v91_v51 }
  0x5f   :  { %v93_v53 = vrot.slane %v92_v52, 1 }
  0x61   :  { %v344_v54 = vmax.f32 %v92_v52, %v93_v53 }
  0x63   :  { %vm95_vm2 = vcmp.eq.f32.partialorder %v86_v46, %v344_v54  ;;  %vm96_vm3 = vcmp.eq.f32.partialorder %v87_v47, %v344_v54 }
  0x64   :  { %v97_v55 = vsel %vm95_vm2, %v326_v26, 16  ;;  %v98_v56 = vsel %vm96_vm3, %v328_v27, 16 }
  0x65   :  { %vm99_vm4 = vcmp.lt.s32.totalorder %v97_v55, %v98_v56 }
  0x66   :  { %v100_v57 = vsel %vm99_vm4, %v97_v55, %v98_v56 }
  0x67   :  { %v101_v58 = vrot.slane %v100_v57, 4 }
  0x69   :  { %vm102_vm5 = vcmp.lt.s32.totalorder %v100_v57, %v101_v58 }
  0x6a   :  { %v103_v59 = vsel %vm102_vm5, %v100_v57, %v101_v58  ;;  %vm162_vm5 = vcmp.lt.s32.totalorder %v338_v45, 0 }
  0x6b   :  { %v104_v60 = vrot.slane %v103_v59, 2 }
  0x6d   :  { %vm105_vm6 = vcmp.lt.s32.totalorder %v103_v59, %v104_v60 }
  0x6e   :  { %v106_v61 = vsel %vm105_vm6, %v103_v59, %v104_v60 }
  0x6f   :  { %v107_v62 = vrot.slane %v106_v61, 1 }
  0x71   :  { %vm108_vm7 = vcmp.lt.s32.totalorder %v106_v61, %v107_v62 }
  0x72   :  { %v350_v63 = vsel %vm108_vm7, %v106_v61, %v107_v62  ;;  %vm176_vm7 = vcmp.gt.s32.totalorder %v338_v45, 0 }
  0x73   :  { %vm110_vm8 = vcmp.eq.s32.totalorder %v326_v26, %v350_v63  ;;  %vm111_vm9 = vcmp.eq.s32.totalorder %v328_v27, %v350_v63  ;;  %vm164_vm6 = vcmp.lt.s32.totalorder %v350_v63, 0  ;;  %v177_v37 = vsel %vm176_vm7, 1, %v300_v23 }
  0x74   :  { %v112_v0 = vsel %vm110_vm8, -inf, %v86_v46  ;;  %v113_v1 = vsel %vm111_vm9, -inf, %v87_v47  ;;  %vm178_vm8 = vcmp.lt.s32.totalorder %v350_v63, %v338_v45  ;;  %vm190_vm9 = vcmp.gt.s32.totalorder %v350_v63, 0 }
  0x75   :  { %v114_v2 = vmax.f32 %v112_v0, %v113_v1  ;;  %v179_v38 = vsel %vm178_vm8, 1, %v300_v23  ;;  %v191_v39 = vsel %vm190_vm9, 1, %v300_v23 }
  0x76   :  { %v180_v47 = vadd.s32 %v179_v38, %v177_v37 }
  0x77   :  { %v115_v3 = vrot.slane %v114_v2, 4 }
  0x79   :  { %v116_v4 = vmax.f32 %v114_v2, %v115_v3 }
  0x7b   :  { %v117_v5 = vrot.slane %v116_v4, 2 }
  0x7d   :  { %v118_v6 = vmax.f32 %v116_v4, %v117_v5 }
  0x7f   :  { %v119_v8 = vrot.slane %v118_v6, 1 }
  0x81   :  { %v356_v9 = vmax.f32 %v118_v6, %v119_v8 }
  0x83   :  { %vm121_vm10 = vcmp.eq.f32.partialorder %v112_v0, %v356_v9  ;;  %vm122_vm11 = vcmp.eq.f32.partialorder %v113_v1, %v356_v9 }
  0x84   :  { %v123_v10 = vsel %vm121_vm10, %v326_v26, 16  ;;  %v124_v12 = vsel %vm122_vm11, %v328_v27, 16  ;;  %vm192_vm10 = vcmp.lt.s32.totalorder %v338_v45, %v350_v63 }
  0x85   :  { %vm125_vm12 = vcmp.lt.s32.totalorder %v123_v10, %v124_v12  ;;  %v193_v40 = vsel %vm192_vm10, 1, %v300_v23 }
  0x86   :  { %v126_v13 = vsel %vm125_vm12, %v123_v10, %v124_v12  ;;  %v194_v49 = vadd.s32 %v193_v40, %v191_v39 }
  0x87   :  { %v127_v14 = vrot.slane %v126_v13, 4 }
  0x89   :  { %vm128_vm13 = vcmp.lt.s32.totalorder %v126_v13, %v127_v14 }
  0x8a   :  { %v129_v15 = vsel %vm128_vm13, %v126_v13, %v127_v14 }
  0x8b   :  { %v130_v16 = vrot.slane %v129_v15, 2 }
  0x8d   :  { %vm131_vm14 = vcmp.lt.s32.totalorder %v129_v15, %v130_v16 }
  0x8e   :  { %v132_v17 = vsel %vm131_vm14, %v129_v15, %v130_v16 }
  0x8f   :  { %v133_v18 = vrot.slane %v132_v17, 1 }
  0x91   :  { %vm134_vm15 = vcmp.lt.s32.totalorder %v132_v17, %v133_v18 }
  0x92   :  { %v362_v19 = vsel %vm134_vm15, %v132_v17, %v133_v18 }
  0x93   :  { %vm136_vm0 = vcmp.eq.s32.totalorder %v326_v26, %v362_v19  ;;  %vm137_vm1 = vcmp.eq.s32.totalorder %v328_v27, %v362_v19  ;;  %vm204_vm11 = vcmp.gt.s32.totalorder %v362_v19, 0  ;;  %vm206_vm12 = vcmp.lt.s32.totalorder %v338_v45, %v362_v19 }
  0x94   :  { %v138_v20 = vsel %vm136_vm0, -inf, %v112_v0  ;;  %v139_v21 = vsel %vm137_vm1, -inf, %v113_v1  ;;  %vm167_vm14 = vcmp.lt.s32.totalorder %v362_v19, 0  ;;  %v205_v42 = vsel %vm204_vm11, 1, %v300_v23 }
  0x95   :  { %v140_v22 = vmax.f32 %v138_v20, %v139_v21  ;;  %v207_v43 = vsel %vm206_vm12, 1, %v300_v23  ;;  %vm181_vm15 = vcmp.lt.s32.totalorder %v362_v19, %v338_v45  ;;  %vm195_vm0 = vcmp.lt.s32.totalorder %v362_v19, %v350_v63 }
  0x96   :  { %vm209_vm1 = vcmp.lt.s32.totalorder %v350_v63, %v362_v19  ;;  %v168_v48 = vsel %vm167_vm14, 1, %v300_v23  ;;  %v208_v50 = vadd.s32 %v207_v43, %v205_v42  ;;  %v182_v52 = vsel %vm181_vm15, 1, %v300_v23 }
  0x97   :  { %v141_v24 = vrot.slane %v140_v22, 4  ;;  %v196_v53 = vsel %vm195_vm0, 1, %v300_v23  ;;  %v210_v55 = vsel %vm209_vm1, 1, %v300_v23  ;;  %v183_v58 = vadd.s32 %v182_v52, %v180_v47 }
  0x98   :  { %v197_v59 = vadd.s32 %v196_v53, %v194_v49  ;;  %v211_v60 = vadd.s32 %v210_v55, %v208_v50 }
  0x99   :  { %v142_v25 = vmax.f32 %v140_v22, %v141_v24 }
  0x9b   :  { %v143_v28 = vrot.slane %v142_v25, 2 }
  0x9d   :  { %v144_v29 = vmax.f32 %v142_v25, %v143_v28 }
  0x9f   :  { %v145_v30 = vrot.slane %v144_v29, 1 }
  0xa1   :  { %v368_v31 = vmax.f32 %v144_v29, %v145_v30 }
  0xa3   :  { %vm147_vm2 = vcmp.eq.f32.partialorder %v138_v20, %v368_v31  ;;  %vm148_vm3 = vcmp.eq.f32.partialorder %v139_v21, %v368_v31 }
  0xa4   :  { %v149_v32 = vsel %vm147_vm2, %v326_v26, 16  ;;  %v150_v33 = vsel %vm148_vm3, %v328_v27, 16  ;;  %v163_v26 = vsel %vm162_vm5, 1, %v300_v23  ;;  %v165_v27 = vsel %vm164_vm6, 1, %v300_v23 }
  0xa5   :  { %vm151_vm4 = vcmp.lt.s32.totalorder %v149_v32, %v150_v33  ;;  %v166_v46 = vadd.s32 %v165_v27, %v163_v26 }
  0xa6   :  { %v152_v34 = vsel %vm151_vm4, %v149_v32, %v150_v33 }
  0xa7   :  { %v153_v35 = vrot.slane %v152_v34, 4  ;;  %v169_v57 = vadd.s32 %v168_v48, %v166_v46 }
  0xa9   :  { %vm154_vm13 = vcmp.lt.s32.totalorder %v152_v34, %v153_v35 }
  0xaa   :  { %v155_v41 = vsel %vm154_vm13, %v152_v34, %v153_v35 }
  0xab   :  { %v156_v44 = vrot.slane %v155_v41, 2 }
  0xad   :  { %vm157_vm2 = vcmp.lt.s32.totalorder %v155_v41, %v156_v44 }
  0xae   :  { %v158_v51 = vsel %vm157_vm2, %v155_v41, %v156_v44 }
  0xaf   :  { %v159_v56 = vrot.slane %v158_v51, 1 }
  0xb1   :  { %vm160_vm3 = vcmp.lt.s32.totalorder %v158_v51, %v159_v56 }
  0xb2   :  { %v161_v61 = vsel %vm160_vm3, %v158_v51, %v159_v56 }
  0xb3   :  { %vm170_vm4 = vcmp.lt.s32.totalorder %v161_v61, 0  ;;  %vm184_vm5 = vcmp.lt.s32.totalorder %v161_v61, %v338_v45  ;;  %vm198_vm6 = vcmp.lt.s32.totalorder %v161_v61, %v350_v63  ;;  %vm212_vm7 = vcmp.lt.s32.totalorder %v161_v61, %v362_v19 }
  0xb4   :  { %v171_v62 = vsel %vm170_vm4, 1, %v300_v23  ;;  %v185_v0 = vsel %vm184_vm5, 1, %v300_v23  ;;  %v199_v1 = vsel %vm198_vm6, 1, %v300_v23  ;;  %v213_v2 = vsel %vm212_vm7, 1, %v300_v23 }
  0xb5   :  { %v172_v3 = vadd.s32 %v171_v62, %v169_v57  ;;  %v186_v4 = vadd.s32 %v185_v0, %v183_v58  ;;  %v200_v5 = vadd.s32 %v199_v1, %v197_v59  ;;  %v214_v6 = vadd.s32 %v213_v2, %v211_v60 }
  0xb6   :  { %vm218_vm8 = vcmp.gt.s32.totalorder %v161_v61, 0  ;;  %vm220_vm9 = vcmp.lt.s32.totalorder %v338_v45, %v161_v61  ;;  %vm223_vm10 = vcmp.lt.s32.totalorder %v350_v63, %v161_v61  ;;  %vm226_vm14 = vcmp.lt.s32.totalorder %v362_v19, %v161_v61 }
  0xb7   :  { %vm173_vm11 = vcmp.eq.s32.totalorder %v315_v7, %v172_v3  ;;  %vm187_vm12 = vcmp.eq.s32.totalorder %v315_v7, %v186_v4  ;;  %vm201_vm13 = vcmp.eq.s32.totalorder %v315_v7, %v200_v5  ;;  %vm215_vm15 = vcmp.eq.s32.totalorder %v315_v7, %v214_v6 }
  0xb8   :  { %v174_v8 = vsel %vm173_vm11, %v318_v11, 0.0  ;;  %v188_v10 = vsel %vm187_vm12, %v332_v36, 0.0  ;;  %v202_v12 = vsel %vm201_vm13, %v344_v54, 0.0  ;;  %v219_v45 = vsel %vm218_vm8, 1, %v300_v23 }
  0xb9   :  { %v189_v13 = vadd.f32 %v188_v10, %v174_v8  ;;  %v221_v63 = vsel %vm220_vm9, 1, %v300_v23  ;;  %v224_v14 = vsel %vm223_vm10, 1, %v300_v23  ;;  %v216_v17 = vsel %vm215_vm15, %v356_v9, 0.0 }
  0xba   :  { %v222_v15 = vadd.s32 %v221_v63, %v219_v45  ;;  %v227_v18 = vsel %vm226_vm14, 1, %v300_v23 }
  0xbb   :  { %v203_v16 = vadd.f32 %v202_v12, %v189_v13 }
  0xbc   :  { %v225_v11 = vadd.s32 %v224_v14, %v222_v15 }
  0xbd   :  { %v217_v19 = vadd.f32 %v216_v17, %v203_v16 }
  0xbe   :  { %v228_v36 = vadd.s32 %v227_v18, %v225_v11 }
  0xc0   :  { %vm229_vm0 = vcmp.eq.s32.totalorder %v315_v7, %v228_v36 }
  0xc1   :  { %v230_v54 = vsel %vm229_vm0, %v368_v31, 0.0 }
  0xc2   :  { %v231_v20 = vadd.f32 %v230_v54, %v217_v19 }
  0xc4   :  { %232 = vst [vmem:[#allocation5] sm:$0x1f] %v231_v20 }
  0xc5   :  { %284 = shalt.err (!%p281_p9)
}
  0xc6   :  { %242 = dma.vmem_to_hbm [thread:$0]  %s240_s13, 128, %s432_s1, [#allocation4]  }
  0xc7   :  { %295 = dma.done.wait [#allocation4], 128  }
  0xc8   :  { %296 = vsyncadd [#allocation4], 4294967168 }
  0xc9   :  { %246 = vsyncpa [#allocation3], 1 }
  0xca   :  { %247 = vsyncpa [#allocation4], 1 }

</bundles_post_ra>
